<compile_context>
chip_gen: v6e
topology: v6e:2x2x1
jax: 0.10.0
libtpu: 0.0.40
codegen_flags: <defaults>
</compile_context>

<pallas_src>
import functools

import numpy as np

import jax
import jax.numpy as jnp
from jax.experimental import pallas as pl
from jax.experimental.pallas import tpu as pltpu


def _dist_head_kernel(x_ref, w1_ref, b1_ref, w2_ref, b2_ref, s_ref,
                      logit_ref, dist_ref, p_flat,
                      *, eps, eps_logit, n_heads, n_atom, atoms_pad,
                      approx_recip):
    # ---- MLP block: (TB, H) @ (H, H) + b1, ReLU (f32 accumulation) ----------
    h = jnp.dot(x_ref[...], w1_ref[...], preferred_element_type=jnp.float32)
    h = jnp.maximum(h + b1_ref[...], 0.0)                        # (TB, H) f32

    # ---- fc_block for all heads fused: one (TB,H) @ (H, M*A_pad) MXU pass ---
    q = jnp.dot(h.astype(w2_ref.dtype), w2_ref[...],
                preferred_element_type=jnp.float32)               # (TB, M*A_pad)
    q = q + b2_ref[...]        # padded atoms carry a -1e30 bias -> 0 softmax mass

    # ---- per-head softmax on 128-lane-aligned static slices ------------------
    for m in range(n_heads):                                      # M is small
        qm = q[:, m * atoms_pad:(m + 1) * atoms_pad]              # (TB, A_pad)
        qm = qm - jnp.max(qm, axis=-1, keepdims=True)             # stable softmax
        p = jnp.exp(qm)
        inv = pl.reciprocal(jnp.sum(p, axis=-1, keepdims=True),
                            approx=approx_recip)                  # EUP if approx
        pm = p * inv                                              # (TB, A_pad)
        p_flat[:, m * atoms_pad:(m + 1) * atoms_pad] = pm         # lane-dense scratch
        dist_ref[:, m, :] = pm[:, :n_atom] + eps                  # only real atoms

    # ---- all head logits with ONE MXU dot vs block-diagonal support ----------
    # logit[:, m] = sum_a softmax[:, m, a] * support[a]  + eps * sum(support)
    logit_ref[...] = (jnp.dot(p_flat[...], s_ref[...],
                              preferred_element_type=jnp.float32) + eps_logit)


def prepare_distribution_head_params(params, *, hidden_size, output_size,
                                     n_atom, v_min, v_max,
                                     matmul_dtype=jnp.bfloat16):
    """One-time parameter layout work. Call once; reuse across forwards."""
    H, M, A = hidden_size, output_size, n_atom
    A_pad = max(128, ((A + 127) // 128) * 128)      # lane-dense atom axis
    NEG = jnp.float32(-1e30)                        # softmax mask for padded atoms

    w1 = params["w1"].astype(matmul_dtype)                              # (H, H)
    b1 = params["b1"].reshape(1, H).astype(jnp.float32)                 # (1, H)

    w2 = params["w2"].reshape(H, M, A).astype(jnp.float32)
    w2_pad = jnp.zeros((H, M, A_pad), jnp.float32).at[:, :, :A].set(w2)
    w2_pad = w2_pad.reshape(H, M * A_pad).astype(matmul_dtype)          # (H, M*A_pad)

    b2 = params["b2"].reshape(M, A).astype(jnp.float32)
    b2_pad = jnp.full((M, A_pad), NEG, jnp.float32).at[:, :A].set(b2)
    b2_pad = b2_pad.reshape(1, M * A_pad)                               # (1, M*A_pad)

    # Block-diagonal support matrix: S[m*A_pad + a, m] = support[a] (0 on pads).
    support = np.linspace(v_min, v_max, A).astype(np.float32)
    s_blk = np.zeros((M, A_pad, M), np.float32)
    for m in range(M):
        s_blk[m, :A, m] = support
    s_blk = jnp.asarray(s_blk.reshape(M * A_pad, M))                    # (M*A_pad, M)

    return {
        "w1": w1, "b1": b1, "w2": w2_pad, "b2": b2_pad, "support_mat": s_blk,
        "hidden_size": H, "output_size": M, "n_atom": A, "atoms_pad": A_pad,
        "support_sum": float(support.sum()),
        "matmul_dtype": matmul_dtype,
    }


def distribution_head_forward(x, prepped, *, eps=1e-6, approx_recip=True):
    """x: (B, hidden). Returns {'logit': (B, M) f32, 'distribution': (B, M, A) f32}."""
    B, H = x.shape
    assert H == prepped["hidden_size"]
    M, A, A_pad = prepped["output_size"], prepped["n_atom"], prepped["atoms_pad"]
    mm_dtype = prepped["matmul_dtype"]

    x_in = x.astype(mm_dtype)

    # Batch tile: large enough to amortize per-grid-step overhead, but arranged
    # so the grid has >= 2 steps whenever possible -> both v7x TCs get whole
    # tiles via the "parallel" dimension semantics.
    TB = min(B, 256, max(8, ((-(-B // 2) + 7) // 8) * 8))
    grid = (pl.cdiv(B, TB),)

    eps_logit = float(eps) * prepped["support_sum"]

    kernel = functools.partial(
        _dist_head_kernel, eps=float(eps), eps_logit=eps_logit,
        n_heads=M, n_atom=A, atoms_pad=A_pad, approx_recip=approx_recip)

    # VMEM estimate: double-buffered tiles + resident (double-buffered) weights
    # + flat softmax scratch, with headroom. Keeps v5e's 16 MiB default from
    # silently constraining larger tiles / H.
    itm = jnp.dtype(mm_dtype).itemsize
    est = (2 * (TB * H * itm                                   # x tile
                + TB * 8 * 4                                   # logit tile (padded)
                + TB * 8 * ((A + 127) // 128) * 128 * 4)       # dist tile (padded)
           + 2 * (H * H * itm + H * M * A_pad * itm            # W1, W2
                  + 2 * M * A_pad * 4 + M * A_pad * M * 4)     # b1, b2, S
           + TB * M * A_pad * 4)                               # p_flat scratch
    vmem_limit = int(min(max(2 * est + (4 << 20), 32 << 20), 64 << 20))

    logit, dist = pl.pallas_call(
        kernel,
        out_shape=(
            jax.ShapeDtypeStruct((B, M), jnp.float32),
            jax.ShapeDtypeStruct((B, M, A), jnp.float32),      # real atoms only
        ),
        grid_spec=pltpu.PrefetchScalarGridSpec(
            num_scalar_prefetch=0,
            grid=grid,
            in_specs=[
                pl.BlockSpec((TB, H), lambda i: (i, 0)),           # x (batch-tiled)
                pl.BlockSpec((H, H), lambda i: (0, 0)),            # W1 (resident)
                pl.BlockSpec((1, H), lambda i: (0, 0)),            # b1
                pl.BlockSpec((H, M * A_pad), lambda i: (0, 0)),    # W2 (fused, padded)
                pl.BlockSpec((1, M * A_pad), lambda i: (0, 0)),    # b2 (padded, -1e30)
                pl.BlockSpec((M * A_pad, M), lambda i: (0, 0)),    # block-diag support
            ],
            out_specs=(
                pl.BlockSpec((TB, M), lambda i: (i, 0)),           # logit
                pl.BlockSpec((TB, M, A), lambda i: (i, 0, 0)),     # dist, unpadded
            ),
            scratch_shapes=[pltpu.VMEM((TB, M * A_pad), jnp.float32)],
        ),
        compiler_params=pltpu.CompilerParams(
            dimension_semantics=("parallel",),
            vmem_limit_bytes=vmem_limit),
    )(x_in, prepped["w1"], prepped["b1"], prepped["w2"], prepped["b2"],
      prepped["support_mat"])

    return {"logit": logit, "distribution": dist}


def _reference_forward(x, params, *, output_size, n_atom, v_min, v_max, eps):
    """Pure-JAX reference mirroring the PyTorch module."""
    h = jnp.maximum(x @ params["w1"] + params["b1"], 0.0)
    q = h @ params["w2"] + params["b2"]
    q = q.reshape(x.shape[0], output_size, n_atom)
    dist = jax.nn.softmax(q, axis=-1) + eps
    support = jnp.linspace(v_min, v_max, n_atom, dtype=jnp.float32)
    logit = jnp.sum(dist * support, axis=-1)
    return {"logit": logit, "distribution": dist}


def _init_params(key, hidden_size, output_size, n_atom):
    """Deterministic PyTorch-Linear-style init: U(-1/sqrt(fan_in), 1/sqrt(fan_in))."""
    k1, k2, k3, k4 = jax.random.split(key, 4)
    bound = 1.0 / float(np.sqrt(hidden_size))
    return {
        "w1": jax.random.uniform(k1, (hidden_size, hidden_size),
                                 jnp.float32, -bound, bound),
        "b1": jax.random.uniform(k2, (hidden_size,), jnp.float32, -bound, bound),
        "w2": jax.random.uniform(k3, (hidden_size, output_size * n_atom),
                                 jnp.float32, -bound, bound),
        "b2": jax.random.uniform(k4, (output_size * n_atom,),
                                 jnp.float32, -bound, bound),
    }


def _check(B, hidden_size, output_size, n_atom, v_min, v_max, eps, key, *,
           matmul_dtype, approx_recip, dist_tol, logit_tol):
    k_x, k_p = jax.random.split(key)
    x = jax.random.normal(k_x, (B, hidden_size), dtype=jnp.float32)
    params = _init_params(k_p, hidden_size, output_size, n_atom)

    prepped = prepare_distribution_head_params(
        params, hidden_size=hidden_size, output_size=output_size,
        n_atom=n_atom, v_min=v_min, v_max=v_max, matmul_dtype=matmul_dtype)

    out = distribution_head_forward(x, prepped, eps=eps, approx_recip=approx_recip)
    jax.block_until_ready(out)

    ref = _reference_forward(x, params, output_size=output_size, n_atom=n_atom,
                             v_min=v_min, v_max=v_max, eps=eps)

    assert out["logit"].shape == (B, output_size)
    assert out["distribution"].shape == (B, output_size, n_atom)
    d_err = float(jnp.max(jnp.abs(out["distribution"] - ref["distribution"])))
    l_err = float(jnp.max(jnp.abs(out["logit"] - ref["logit"])))
    assert jnp.allclose(out["distribution"], ref["distribution"],
                        rtol=1e-3, atol=dist_tol), f"dist max abs err {d_err}"
    assert jnp.allclose(out["logit"], ref["logit"],
                        rtol=1e-3, atol=logit_tol), f"logit max abs err {l_err}"


if __name__ == "__main__":
    hidden_size, output_size, n_atom = 32, 4, 51
    v_min, v_max, eps = -10.0, 10.0, 1e-6
    key = jax.random.PRNGKey(0)
    k_a, k_b, k_c = jax.random.split(key, 3)

    # Exact path (f32 MXU inputs, exact reciprocal): tiny batch, grid=(1,).
    _check(8, hidden_size, output_size, n_atom, v_min, v_max, eps, k_a,
           matmul_dtype=jnp.float32, approx_recip=False,
           dist_tol=1e-3, logit_tol=5e-2)
    # Exact path, larger batch -> TB=128, grid=(2,): exercises tiling/pipelining
    # and megacore "parallel" sharding.
    _check(256, hidden_size, output_size, n_atom, v_min, v_max, eps, k_b,
           matmul_dtype=jnp.float32, approx_recip=False,
           dist_tol=1e-3, logit_tol=5e-2)
    # Production path (bf16 MXU inputs + EUP approx reciprocal): loose tolerances.
    _check(256, hidden_size, output_size, n_atom, v_min, v_max, eps, k_c,
           matmul_dtype=jnp.bfloat16, approx_recip=True,
           dist_tol=5e-2, logit_tol=0.5)

    print("KERNEL_OK")
</pallas_src>

<mosaic_0001>
module attributes {stable_mosaic.version = 11 : i64} {
  func.func @_dist_head_kernel(%arg0: i32, %arg1: memref<8x32xf32, #tpu.memory_space<vmem>>, %arg2: memref<32x32xf32, #tpu.memory_space<vmem>>, %arg3: memref<1x32xf32, #tpu.memory_space<vmem>>, %arg4: memref<32x512xf32, #tpu.memory_space<vmem>>, %arg5: memref<1x512xf32, #tpu.memory_space<vmem>>, %arg6: memref<512x4xf32, #tpu.memory_space<vmem>>, %arg7: memref<8x4xf32, #tpu.memory_space<vmem>>, %arg8: memref<8x4x51xf32, #tpu.memory_space<vmem>>, %arg9: memref<8x512xf32, #tpu.memory_space<vmem>>) attributes {dimension_semantics = [#tpu.dimension_semantics<parallel>], iteration_bounds = array<i64: 1>, scalar_prefetch = 0 : i64, scratch_operands = 1 : i64, tpu.core_type = #tpu.core_type<tc>, window_params = [{transform_indices = @transform_0, window_bounds = array<i64: 8, 32>}, {pipeline_mode = #tpu.pipeline_mode<synchronous>, transform_indices = @transform_1, window_bounds = array<i64: 32, 32>}, {pipeline_mode = #tpu.pipeline_mode<synchronous>, transform_indices = @transform_2, window_bounds = array<i64: 1, 32>}, {pipeline_mode = #tpu.pipeline_mode<synchronous>, transform_indices = @transform_3, window_bounds = array<i64: 32, 512>}, {pipeline_mode = #tpu.pipeline_mode<synchronous>, transform_indices = @transform_4, window_bounds = array<i64: 1, 512>}, {pipeline_mode = #tpu.pipeline_mode<synchronous>, transform_indices = @transform_5, window_bounds = array<i64: 512, 4>}, {transform_indices = @transform_6, window_bounds = array<i64: 8, 4>}, {transform_indices = @transform_7, window_bounds = array<i64: 8, 4, 51>}]} {
    %c0 = arith.constant 0 : index
    %c0_0 = arith.constant 0 : index
    %0 = vector.load %arg1[%c0, %c0_0] : memref<8x32xf32, #tpu.memory_space<vmem>>, vector<8x32xf32>
    %c0_1 = arith.constant 0 : index
    %c0_2 = arith.constant 0 : index
    %1 = vector.load %arg2[%c0_1, %c0_2] : memref<32x32xf32, #tpu.memory_space<vmem>>, vector<32x32xf32>
    %cst = arith.constant dense<0.000000e+00> : vector<8x32xf32>
    %2 = tpu.matmul %0, %1, %cst {dimension_numbers = #tpu.dot_dimension_numbers<[1], [0], [0], [1], [0, 0, 1, 1], [], []>} : vector<8x32xf32>, vector<32x32xf32>, vector<8x32xf32> -> vector<8x32xf32>
    %c0_3 = arith.constant 0 : index
    %c0_4 = arith.constant 0 : index
    %3 = vector.load %arg3[%c0_3, %c0_4] : memref<1x32xf32, #tpu.memory_space<vmem>>, vector<1x32xf32>
    %4 = vector.broadcast %3 : vector<1x32xf32> to vector<8x32xf32>
    %5 = arith.addf %2, %4 : vector<8x32xf32>
    %cst_5 = arith.constant 0.000000e+00 : f32
    %6 = vector.broadcast %cst_5 : f32 to vector<8x32xf32>
    %7 = arith.maximumf %5, %6 : vector<8x32xf32>
    %c0_6 = arith.constant 0 : index
    %c0_7 = arith.constant 0 : index
    %8 = vector.load %arg4[%c0_6, %c0_7] : memref<32x512xf32, #tpu.memory_space<vmem>>, vector<32x512xf32>
    %cst_8 = arith.constant dense<0.000000e+00> : vector<8x512xf32>
    %9 = tpu.matmul %7, %8, %cst_8 {dimension_numbers = #tpu.dot_dimension_numbers<[1], [0], [0], [1], [0, 0, 1, 1], [], []>} : vector<8x32xf32>, vector<32x512xf32>, vector<8x512xf32> -> vector<8x512xf32>
    %c0_9 = arith.constant 0 : index
    %c0_10 = arith.constant 0 : index
    %10 = vector.load %arg5[%c0_9, %c0_10] : memref<1x512xf32, #tpu.memory_space<vmem>>, vector<1x512xf32>
    %11 = vector.broadcast %10 : vector<1x512xf32> to vector<8x512xf32>
    %12 = arith.addf %9, %11 : vector<8x512xf32>
    %13 = vector.extract_strided_slice %12 {offsets = [0, 0], sizes = [8, 128], strides = [1, 1]} : vector<8x512xf32> to vector<8x128xf32>
    %cst_11 = arith.constant dense<0xFF800000> : vector<8xf32>
    %14 = vector.multi_reduction <maximumf>, %13, %cst_11 [1] : vector<8x128xf32> to vector<8xf32>
    %15 = vector.shape_cast %14 : vector<8xf32> to vector<8x1xf32>
    %16 = vector.broadcast %15 : vector<8x1xf32> to vector<8x128xf32>
    %17 = arith.subf %13, %16 : vector<8x128xf32>
    %18 = math.exp %17 : vector<8x128xf32>
    %cst_12 = arith.constant dense<0.000000e+00> : vector<8xf32>
    %19 = vector.multi_reduction <add>, %18, %cst_12 [1] : vector<8x128xf32> to vector<8xf32>
    %20 = vector.shape_cast %19 : vector<8xf32> to vector<8x1xf32>
    %21 = tpu.reciprocal %20 : vector<8x1xf32> -> vector<8x1xf32>
    %22 = vector.broadcast %21 : vector<8x1xf32> to vector<8x128xf32>
    %23 = arith.mulf %18, %22 : vector<8x128xf32>
    %c0_13 = arith.constant 0 : index
    %c0_14 = arith.constant 0 : index
    %24 = vector.load %arg9[%c0_13, %c0_14] : memref<8x512xf32, #tpu.memory_space<vmem>>, vector<8x128xf32>
    tpu.vector_store %arg9[%c0_13, %c0_14], %23 {strides = array<i32>} : memref<8x512xf32, #tpu.memory_space<vmem>>, vector<8x128xf32>,
    %25 = vector.extract_strided_slice %23 {offsets = [0, 0], sizes = [8, 51], strides = [1, 1]} : vector<8x128xf32> to vector<8x51xf32>
    %cst_15 = arith.constant 9.99999997E-7 : f32
    %26 = vector.broadcast %cst_15 : f32 to vector<8x51xf32>
    %27 = arith.addf %25, %26 : vector<8x51xf32>
    %c0_16 = arith.constant 0 : index
    %c0_17 = arith.constant 0 : index
    %c0_18 = arith.constant 0 : index
    %28 = vector.load %arg8[%c0_16, %c0_17, %c0_18] : memref<8x4x51xf32, #tpu.memory_space<vmem>>, vector<8x1x51xf32>
    %29 = vector.shape_cast %28 : vector<8x1x51xf32> to vector<8x51xf32>
    %30 = vector.shape_cast %27 : vector<8x51xf32> to vector<8x1x51xf32>
    tpu.vector_store %arg8[%c0_16, %c0_17, %c0_18], %30 {strides = array<i32>} : memref<8x4x51xf32, #tpu.memory_space<vmem>>, vector<8x1x51xf32>,
    %31 = vector.extract_strided_slice %12 {offsets = [0, 128], sizes = [8, 128], strides = [1, 1]} : vector<8x512xf32> to vector<8x128xf32>
    %cst_19 = arith.constant dense<0xFF800000> : vector<8xf32>
    %32 = vector.multi_reduction <maximumf>, %31, %cst_19 [1] : vector<8x128xf32> to vector<8xf32>
    %33 = vector.shape_cast %32 : vector<8xf32> to vector<8x1xf32>
    %34 = vector.broadcast %33 : vector<8x1xf32> to vector<8x128xf32>
    %35 = arith.subf %31, %34 : vector<8x128xf32>
    %36 = math.exp %35 : vector<8x128xf32>
    %cst_20 = arith.constant dense<0.000000e+00> : vector<8xf32>
    %37 = vector.multi_reduction <add>, %36, %cst_20 [1] : vector<8x128xf32> to vector<8xf32>
    %38 = vector.shape_cast %37 : vector<8xf32> to vector<8x1xf32>
    %39 = tpu.reciprocal %38 : vector<8x1xf32> -> vector<8x1xf32>
    %40 = vector.broadcast %39 : vector<8x1xf32> to vector<8x128xf32>
    %41 = arith.mulf %36, %40 : vector<8x128xf32>
    %c0_21 = arith.constant 0 : index
    %c128 = arith.constant 128 : index
    %42 = vector.load %arg9[%c0_21, %c128] : memref<8x512xf32, #tpu.memory_space<vmem>>, vector<8x128xf32>
    tpu.vector_store %arg9[%c0_21, %c128], %41 {strides = array<i32>} : memref<8x512xf32, #tpu.memory_space<vmem>>, vector<8x128xf32>,
    %43 = vector.extract_strided_slice %41 {offsets = [0, 0], sizes = [8, 51], strides = [1, 1]} : vector<8x128xf32> to vector<8x51xf32>
    %cst_22 = arith.constant 9.99999997E-7 : f32
    %44 = vector.broadcast %cst_22 : f32 to vector<8x51xf32>
    %45 = arith.addf %43, %44 : vector<8x51xf32>
    %c0_23 = arith.constant 0 : index
    %c1 = arith.constant 1 : index
    %c0_24 = arith.constant 0 : index
    %46 = vector.load %arg8[%c0_23, %c1, %c0_24] : memref<8x4x51xf32, #tpu.memory_space<vmem>>, vector<8x1x51xf32>
    %47 = vector.shape_cast %46 : vector<8x1x51xf32> to vector<8x51xf32>
    %48 = vector.shape_cast %45 : vector<8x51xf32> to vector<8x1x51xf32>
    tpu.vector_store %arg8[%c0_23, %c1, %c0_24], %48 {strides = array<i32>} : memref<8x4x51xf32, #tpu.memory_space<vmem>>, vector<8x1x51xf32>,
    %49 = vector.extract_strided_slice %12 {offsets = [0, 256], sizes = [8, 128], strides = [1, 1]} : vector<8x512xf32> to vector<8x128xf32>
    %cst_25 = arith.constant dense<0xFF800000> : vector<8xf32>
    %50 = vector.multi_reduction <maximumf>, %49, %cst_25 [1] : vector<8x128xf32> to vector<8xf32>
    %51 = vector.shape_cast %50 : vector<8xf32> to vector<8x1xf32>
    %52 = vector.broadcast %51 : vector<8x1xf32> to vector<8x128xf32>
    %53 = arith.subf %49, %52 : vector<8x128xf32>
    %54 = math.exp %53 : vector<8x128xf32>
    %cst_26 = arith.constant dense<0.000000e+00> : vector<8xf32>
    %55 = vector.multi_reduction <add>, %54, %cst_26 [1] : vector<8x128xf32> to vector<8xf32>
    %56 = vector.shape_cast %55 : vector<8xf32> to vector<8x1xf32>
    %57 = tpu.reciprocal %56 : vector<8x1xf32> -> vector<8x1xf32>
    %58 = vector.broadcast %57 : vector<8x1xf32> to vector<8x128xf32>
    %59 = arith.mulf %54, %58 : vector<8x128xf32>
    %c0_27 = arith.constant 0 : index
    %c256 = arith.constant 256 : index
    %60 = vector.load %arg9[%c0_27, %c256] : memref<8x512xf32, #tpu.memory_space<vmem>>, vector<8x128xf32>
    tpu.vector_store %arg9[%c0_27, %c256], %59 {strides = array<i32>} : memref<8x512xf32, #tpu.memory_space<vmem>>, vector<8x128xf32>,
    %61 = vector.extract_strided_slice %59 {offsets = [0, 0], sizes = [8, 51], strides = [1, 1]} : vector<8x128xf32> to vector<8x51xf32>
    %cst_28 = arith.constant 9.99999997E-7 : f32
    %62 = vector.broadcast %cst_28 : f32 to vector<8x51xf32>
    %63 = arith.addf %61, %62 : vector<8x51xf32>
    %c0_29 = arith.constant 0 : index
    %c2 = arith.constant 2 : index
    %c0_30 = arith.constant 0 : index
    %64 = vector.load %arg8[%c0_29, %c2, %c0_30] : memref<8x4x51xf32, #tpu.memory_space<vmem>>, vector<8x1x51xf32>
    %65 = vector.shape_cast %64 : vector<8x1x51xf32> to vector<8x51xf32>
    %66 = vector.shape_cast %63 : vector<8x51xf32> to vector<8x1x51xf32>
    tpu.vector_store %arg8[%c0_29, %c2, %c0_30], %66 {strides = array<i32>} : memref<8x4x51xf32, #tpu.memory_space<vmem>>, vector<8x1x51xf32>,
    %67 = vector.extract_strided_slice %12 {offsets = [0, 384], sizes = [8, 128], strides = [1, 1]} : vector<8x512xf32> to vector<8x128xf32>
    %cst_31 = arith.constant dense<0xFF800000> : vector<8xf32>
    %68 = vector.multi_reduction <maximumf>, %67, %cst_31 [1] : vector<8x128xf32> to vector<8xf32>
    %69 = vector.shape_cast %68 : vector<8xf32> to vector<8x1xf32>
    %70 = vector.broadcast %69 : vector<8x1xf32> to vector<8x128xf32>
    %71 = arith.subf %67, %70 : vector<8x128xf32>
    %72 = math.exp %71 : vector<8x128xf32>
    %cst_32 = arith.constant dense<0.000000e+00> : vector<8xf32>
    %73 = vector.multi_reduction <add>, %72, %cst_32 [1] : vector<8x128xf32> to vector<8xf32>
    %74 = vector.shape_cast %73 : vector<8xf32> to vector<8x1xf32>
    %75 = tpu.reciprocal %74 : vector<8x1xf32> -> vector<8x1xf32>
    %76 = vector.broadcast %75 : vector<8x1xf32> to vector<8x128xf32>
    %77 = arith.mulf %72, %76 : vector<8x128xf32>
    %c0_33 = arith.constant 0 : index
    %c384 = arith.constant 384 : index
    %78 = vector.load %arg9[%c0_33, %c384] : memref<8x512xf32, #tpu.memory_space<vmem>>, vector<8x128xf32>
    tpu.vector_store %arg9[%c0_33, %c384], %77 {strides = array<i32>} : memref<8x512xf32, #tpu.memory_space<vmem>>, vector<8x128xf32>,
    %79 = vector.extract_strided_slice %77 {offsets = [0, 0], sizes = [8, 51], strides = [1, 1]} : vector<8x128xf32> to vector<8x51xf32>
    %cst_34 = arith.constant 9.99999997E-7 : f32
    %80 = vector.broadcast %cst_34 : f32 to vector<8x51xf32>
    %81 = arith.addf %79, %80 : vector<8x51xf32>
    %c0_35 = arith.constant 0 : index
    %c3 = arith.constant 3 : index
    %c0_36 = arith.constant 0 : index
    %82 = vector.load %arg8[%c0_35, %c3, %c0_36] : memref<8x4x51xf32, #tpu.memory_space<vmem>>, vector<8x1x51xf32>
    %83 = vector.shape_cast %82 : vector<8x1x51xf32> to vector<8x51xf32>
    %84 = vector.shape_cast %81 : vector<8x51xf32> to vector<8x1x51xf32>
    tpu.vector_store %arg8[%c0_35, %c3, %c0_36], %84 {strides = array<i32>} : memref<8x4x51xf32, #tpu.memory_space<vmem>>, vector<8x1x51xf32>,
    %c0_37 = arith.constant 0 : index
    %c0_38 = arith.constant 0 : index
    %85 = vector.load %arg9[%c0_37, %c0_38] : memref<8x512xf32, #tpu.memory_space<vmem>>, vector<8x512xf32>
    %c0_39 = arith.constant 0 : index
    %c0_40 = arith.constant 0 : index
    %86 = vector.load %arg6[%c0_39, %c0_40] : memref<512x4xf32, #tpu.memory_space<vmem>>, vector<512x4xf32>
    %cst_41 = arith.constant dense<0.000000e+00> : vector<8x4xf32>
    %87 = tpu.matmul %85, %86, %cst_41 {dimension_numbers = #tpu.dot_dimension_numbers<[1], [0], [0], [1], [0, 0, 1, 1], [], []>} : vector<8x512xf32>, vector<512x4xf32>, vector<8x4xf32> -> vector<8x4xf32>
    %cst_42 = arith.constant 1.90734863E-12 : f32
    %88 = vector.broadcast %cst_42 : f32 to vector<8x4xf32>
    %89 = arith.addf %87, %88 : vector<8x4xf32>
    %c0_43 = arith.constant 0 : index
    %c0_44 = arith.constant 0 : index
    %90 = vector.load %arg7[%c0_43, %c0_44] : memref<8x4xf32, #tpu.memory_space<vmem>>, vector<8x4xf32>
    tpu.vector_store %arg7[%c0_43, %c0_44], %89 {strides = array<i32>} : memref<8x4xf32, #tpu.memory_space<vmem>>, vector<8x4xf32>,
    return
  }
  func.func @transform_0(%arg0: i32) -> (i32, i32) {
    %c0_i32 = arith.constant 0 : i32
    %c0_i32_0 = arith.constant 0 : i32
    return %arg0, %c0_i32 : i32, i32
  }
  func.func @transform_1(%arg0: i32) -> (i32, i32) {
    %c0_i32 = arith.constant 0 : i32
    %c0_i32_0 = arith.constant 0 : i32
    %c0_i32_1 = arith.constant 0 : i32
    return %c0_i32, %c0_i32_0 : i32, i32
  }
  func.func @transform_2(%arg0: i32) -> (i32, i32) {
    %c0_i32 = arith.constant 0 : i32
    %c0_i32_0 = arith.constant 0 : i32
    %c0_i32_1 = arith.constant 0 : i32
    return %c0_i32, %c0_i32_0 : i32, i32
  }
  func.func @transform_3(%arg0: i32) -> (i32, i32) {
    %c0_i32 = arith.constant 0 : i32
    %c0_i32_0 = arith.constant 0 : i32
    %c0_i32_1 = arith.constant 0 : i32
    return %c0_i32, %c0_i32_0 : i32, i32
  }
  func.func @transform_4(%arg0: i32) -> (i32, i32) {
    %c0_i32 = arith.constant 0 : i32
    %c0_i32_0 = arith.constant 0 : i32
    %c0_i32_1 = arith.constant 0 : i32
    return %c0_i32, %c0_i32_0 : i32, i32
  }
  func.func @transform_5(%arg0: i32) -> (i32, i32) {
    %c0_i32 = arith.constant 0 : i32
    %c0_i32_0 = arith.constant 0 : i32
    %c0_i32_1 = arith.constant 0 : i32
    return %c0_i32, %c0_i32_0 : i32, i32
  }
  func.func @transform_6(%arg0: i32) -> (i32, i32) {
    %c0_i32 = arith.constant 0 : i32
    %c0_i32_0 = arith.constant 0 : i32
    return %arg0, %c0_i32 : i32, i32
  }
  func.func @transform_7(%arg0: i32) -> (i32, i32, i32) {
    %c0_i32 = arith.constant 0 : i32
    %c0_i32_0 = arith.constant 0 : i32
    %c0_i32_1 = arith.constant 0 : i32
    return %arg0, %c0_i32, %c0_i32_0 : i32, i32, i32
  }
}

</mosaic_0001>

<bundles_post_ra>
// kernel: tpu_custom_call.1
= control target key start
LH: loop header
LB: loop body
LE: loop exit
PB: predicated region body
PF: predicated region fallthrough
CT: control target
= control target key end

     0   :  { %v969_v1 = vmov 0.0   ;;  %vm970_vm0 = vmmov 0   ;;  %s1366_s0 = inlined_call_operand.vmem [shape: f32[8,32], index: 0, kind: input, shape index: {}]   ;;  %s1367_s1 = inlined_call_operand.vmem [shape: f32[32,32], index: 1, kind: input, shape index: {}]   ;;  %s1368_s2 = inlined_call_operand.vmem [shape: f32[1,32], index: 2, kind: input, shape index: {}]   ;;  %s1369_s3 = inlined_call_operand.vmem [shape: f32[32,512], index: 3, kind: input, shape index: {}]   ;;  %s1370_s4 = inlined_call_operand.vmem [shape: f32[1,512], index: 4, kind: input, shape index: {}]   ;;  %s1371_s5 = inlined_call_operand.vmem [shape: f32[512,4], index: 5, kind: input, shape index: {}]   ;;  %s1372_s6 = inlined_call_operand.vmem [shape: f32[8,4], index: 6, kind: output, shape index: {0}]   ;;  %s1373_s7 = inlined_call_operand.hbm [shape: f32[8,4,51], index: 7, kind: output, shape index: {1}]  }
   0x1   :  { %v30_v0 = vld [vmem:[%s1367_s1 + $0x18] sm:$0xff]  ;;  %914 = vmatprep.subr.mxu0 %v969_v1  ;;  %v29_v2 = vld [vmem:[%s1367_s1 + $0x10] sm:$0xff]  ;;  %922 = vmatprep.mubr.msk.f32.mxu0 %vm970_vm0, %v969_v1  ;;  %v126_v3 = vld [vmem:[%s1369_s3 + $0x68] sm:$0xff] }
   0x2   :  { %915 = vmatpush3.msra.mxu0 %v30_v0  ;;  %178 = vmatprep.subr.mxu1 %v126_v3  ;;  %v125_v4 = vld [vmem:[%s1369_s3 + $0x60] sm:$0xff]  ;;  %v28_v5 = vld [vmem:[%s1367_s1 + $0x8] sm:$0xff] }
   0x3   :  { %916 = vmatprep.subr.mxu0 %v969_v1  ;;  %179 = vmatpush1.msra.mxu1 %v125_v4  ;;  %v122_v6 = vld [vmem:[%s1369_s3 + $0x48] sm:$0xff] }
   0x4   :  { %917 = vmatpush3.msra.mxu0 %v29_v2  ;;  %180 = vmatprep.subr.mxu1 %v122_v6 }
   0x5   :  { %13 = vsyncpa [#allocation4], 0  ;;  %918 = vmatprep.subr.mxu0 %v969_v1  ;;  %v27_v7 = vld [vmem:[%s1367_s1] sm:$0xff]  ;;  %218 = vmatprep.mubr.f32.mxu1 %v969_v1  ;;  %vm38_vm1 = vcmask 261120   ;;  %v128_v9 = vld [vmem:[%s1369_s3 + $0x78] sm:$0xff]  ;;  %v131_v27 = vlaneseq  ;;  %vm365_vm2 = vcmask 409600  }
   0x6   :  { %919 = vmatpush3.msra.mxu0 %v28_v5  ;;  %v26_v8 = vld [vmem:[%s1366_s0] sm:$0xff]  ;;  %v127_v10 = vld [vmem:[%s1369_s3 + $0x70] sm:$0xff]  ;;  %v124_v11 = vld [vmem:[%s1369_s3 + $0x58] sm:$0xff] }
   0x7   :  { %920 = vmatprep.subr.mxu0 %v969_v1  ;;  %v121_v12 = vld [vmem:[%s1369_s3 + $0x40] sm:$0xff]  ;;  %v123_v13 = vld [vmem:[%s1369_s3 + $0x50] sm:$0xff]  ;;  %v118_v14 = vld [vmem:[%s1369_s3 + $0x28] sm:$0xff]  ;;  %v1084_v28 = vshrl.u32 %v131_v27, 7 }
   0x8   :  { %921 = vmatpush3.msra.mxu0 %v27_v7  ;;  %181 = vmatpush1.msra.mxu1 %v121_v12  ;;  %v120_v15 = vld [vmem:[%s1369_s3 + $0x38] sm:$0xff]  ;;  %v117_v16 = vld [vmem:[%s1369_s3 + $0x20] sm:$0xff]  ;;  %v119_v17 = vld [vmem:[%s1369_s3 + $0x30] sm:$0xff] }
   0x9   :  { %923 = vmatmul.mubr.msk.f32.vlgmr.msra.gmra.mxu0 %vm38_vm1, %v26_v8  ;;  %249 = vmatprep.subr.mxu0 %v128_v9  ;;  %v114_v18 = vld [vmem:[%s1369_s3 + $0x8] sm:$0xff]  ;;  %v116_v19 = vld [vmem:[%s1369_s3 + $0x18] sm:$0xff]  ;;  %v113_v20 = vld [vmem:[%s1369_s3] sm:$0xff]  ;;  %v137_v29 = vsub.s32 1, %v1084_v28  ;;  %v145_v30 = vsub.s32 3, %v1084_v28  ;;  %v133_v32 = vsub.s32 0, %v1084_v28 }
   0xa   :  { %250 = vmatpush1.msra.mxu0 %v127_v10  ;;  %289 = vmatprep.mubr.f32.mxu0 %v969_v1  ;;  %v115_v21 = vld [vmem:[%s1369_s3 + $0x10] sm:$0xff]  ;;  %v835_v22 = vld [vmem:[%s1368_s2] ss:$0 sm:$0xff]  ;;  %v141_v33 = vsub.s32 2, %v1084_v28  ;;  %v640_v46 = vld [vmem:[%s1371_s5 + $0xf8] sm:$0xff] }
   0xb   :  { %251 = vmatprep.subr.mxu0 %v124_v11  ;;  %182 = vmatprep.subr.mxu1 %v118_v14  ;;  %v129_v31 = vld [vmem:[%s1370_s4] sm:$0xf]  ;;  %v624_v47 = vld [vmem:[%s1371_s5 + $0x78] sm:$0xff]  ;;  %v639_v48 = vld [vmem:[%s1371_s5 + $0xf0] sm:$0xff] }
   0xc   :  { %252 = vmatpush1.msra.mxu0 %v123_v13  ;;  %183 = vmatpush1.msra.mxu1 %v117_v16  ;;  %v138_v34 = vrot.slane %v129_v31, %v137_v29  ;;  %v146_v35 = vrot.slane %v129_v31, %v145_v30  ;;  %v134_v40 = vrot.slane %v129_v31, %v133_v32  ;;  %v623_v49 = vld [vmem:[%s1371_s5 + $0x70] sm:$0xff]  ;;  %v672_v50 = vld [vmem:[%s1371_s5 + $0x1f8] sm:$0xff]  ;;  %v638_v51 = vld [vmem:[%s1371_s5 + $0xe8] sm:$0xff] }
   0xd   :  { %253 = vmatprep.subr.mxu0 %v120_v15  ;;  %184 = vmatprep.subr.mxu1 %v114_v18  ;;  %v142_v41 = vrot.slane %v129_v31, %v141_v33  ;;  %v656_v52 = vld [vmem:[%s1371_s5 + $0x178] sm:$0xff]  ;;  %v622_v53 = vld [vmem:[%s1371_s5 + $0x68] sm:$0xff]  ;;  %v671_v54 = vld [vmem:[%s1371_s5 + $0x1f0] sm:$0xff] }
   0xe   :  { %254 = vmatpush1.msra.mxu0 %v119_v17  ;;  %185 = vmatpush1.msra.mxu1 %v113_v20  ;;  %v655_v55 = vld [vmem:[%s1371_s5 + $0x170] sm:$0xff]  ;;  %v637_v56 = vld [vmem:[%s1371_s5 + $0xe0] sm:$0xff]  ;;  %v670_v57 = vld [vmem:[%s1371_s5 + $0x1e8] sm:$0xff] }
   0xf   :  { %255 = vmatprep.subr.mxu0 %v116_v19  ;;  %844 = vmatprep.subr.mxu1 %v640_v46  ;;  %v621_v58 = vld [vmem:[%s1371_s5 + $0x60] sm:$0xff]  ;;  %v654_v59 = vld [vmem:[%s1371_s5 + $0x168] sm:$0xff]  ;;  %v636_v61 = vld [vmem:[%s1371_s5 + $0xd8] sm:$0xff] }
  0x10   :  { %256 = vmatpush1.msra.mxu0 %v115_v21  ;;  %v669_v60 = vld [vmem:[%s1371_s5 + $0x1e0] sm:$0xff]  ;;  %v620_v63 = vld [vmem:[%s1371_s5 + $0x58] sm:$0xff]  ;;  %v635_v0 = vld [vmem:[%s1371_s5 + $0xd0] sm:$0xff] }
  0x11   :  { %879 = vmatprep.subr.mxu0 %v672_v50  ;;  %v653_v62 = vld [vmem:[%s1371_s5 + $0x160] sm:$0xff]  ;;  %v619_v1 = vld [vmem:[%s1371_s5 + $0x50] sm:$0xff]  ;;  %v634_v18 = vld [vmem:[%s1371_s5 + $0xc8] sm:$0xff] }
  0x12   :  { %v668_v19 = vld [vmem:[%s1371_s5 + $0x1d8] sm:$0xff]  ;;  %v618_v20 = vld [vmem:[%s1371_s5 + $0x48] sm:$0xff]  ;;  %v631_v31 = vld [vmem:[%s1371_s5 + $0xb0] sm:$0xff] }
  0x13   :  { %v652_v21 = vld [vmem:[%s1371_s5 + $0x158] sm:$0xff]  ;;  %v666_v27 = vld [vmem:[%s1371_s5 + $0x1c8] sm:$0xff]  ;;  %v665_v32 = vld [vmem:[%s1371_s5 + $0x1c0] sm:$0xff] }
  0x14   :  { %v616_v29 = vld [vmem:[%s1371_s5 + $0x38] sm:$0xff]  ;;  %v650_v30 = vld [vmem:[%s1371_s5 + $0x148] sm:$0xff]  ;;  %v615_v33 = vld [vmem:[%s1371_s5 + $0x30] sm:$0xff] }
  0x15   :  { %v646_v46 = vld [vmem:[%s1371_s5 + $0x128] sm:$0xff]  ;;  %v645_v50 = vld [vmem:[%s1371_s5 + $0x120] sm:$0xff] }
  0xc9   :  { %v108_v23 = vpop.f32.mrf.mxu0 }
  0xca   :  { %v109_v24 = vadd.f32 %v835_v22, %v108_v23  ;;  %v633_v22 = vld [vmem:[%s1371_s5 + $0xc0] sm:$0xff]  ;;  %v667_v23 = vld [vmem:[%s1371_s5 + $0x1d0] sm:$0xff] }
  0xcb   :  { %v924_v25 = vpop.f32.mrf.mxu0 }
  0xcc   :  { %v112_v26 = vmax.f32 %v109_v24, 0.0  ;;  %v617_v24 = vld [vmem:[%s1371_s5 + $0x40] sm:$0xff]  ;;  %v651_v25 = vld [vmem:[%s1371_s5 + $0x150] sm:$0xff] }
  0xce   :  { %837 = vmatmul.mubr.msk.f32.vlgmr.msra.gmra.mxu1 %vm38_vm1, %v112_v26  ;;  %838 = vmatmul.mubr.msk.f32.vlgmr.msra.gmra.mxu0 %vm38_vm1, %v112_v26  ;;  %v632_v26 = vld [vmem:[%s1371_s5 + $0xb8] sm:$0xff] }
  0xcf   :  { %845 = vmatpush3.msra.mxu1 %v624_v47  ;;  %880 = vmatpush3.msra.mxu0 %v656_v52  ;;  %v627_v47 = vld [vmem:[%s1371_s5 + $0x90] sm:$0xff]  ;;  %v660_v52 = vld [vmem:[%s1371_s5 + $0x198] sm:$0xff] }
  0xd0   :  { %846 = vmatprep.subr.mxu1 %v639_v48  ;;  %881 = vmatprep.subr.mxu0 %v671_v54  ;;  %v661_v48 = vld [vmem:[%s1371_s5 + $0x1a0] sm:$0xff]  ;;  %v644_v54 = vld [vmem:[%s1371_s5 + $0x118] sm:$0xff] }
  0xd1   :  { %847 = vmatpush3.msra.mxu1 %v623_v49  ;;  %882 = vmatpush3.msra.mxu0 %v655_v55  ;;  %v611_v49 = vld [vmem:[%s1371_s5 + $0x10] sm:$0xff]  ;;  %v625_v55 = vld [vmem:[%s1371_s5 + $0x80] sm:$0xff] }
  0xd2   :  { %848 = vmatprep.subr.mxu1 %v638_v51  ;;  %883 = vmatprep.subr.mxu0 %v670_v57  ;;  %v626_v51 = vld [vmem:[%s1371_s5 + $0x88] sm:$0xff]  ;;  %v609_v57 = vld [vmem:[%s1371_s5] sm:$0xff] }
  0xd3   :  { %849 = vmatpush3.msra.mxu1 %v622_v53  ;;  %884 = vmatpush3.msra.mxu0 %v654_v59  ;;  %v610_v53 = vld [vmem:[%s1371_s5 + $0x8] sm:$0xff] }
  0xd4   :  { %850 = vmatprep.subr.mxu1 %v637_v56  ;;  %885 = vmatprep.subr.mxu0 %v669_v60  ;;  %v659_v56 = vld [vmem:[%s1371_s5 + $0x190] sm:$0xff]  ;;  %v658_v59 = vld [vmem:[%s1371_s5 + $0x188] sm:$0xff] }
  0xd5   :  { %851 = vmatpush3.msra.mxu1 %v621_v58  ;;  %886 = vmatpush3.msra.mxu0 %v653_v62  ;;  %v643_v58 = vld [vmem:[%s1371_s5 + $0x110] sm:$0xff]  ;;  %v642_v60 = vld [vmem:[%s1371_s5 + $0x108] sm:$0xff]  ;;  %v641_v62 = vld [vmem:[%s1371_s5 + $0x100] sm:$0xff] }
  0xd6   :  { %852 = vmatprep.subr.mxu1 %v636_v61  ;;  %887 = vmatprep.subr.mxu0 %v668_v19  ;;  %v657_v61 = vld [vmem:[%s1371_s5 + $0x180] sm:$0xff] }
  0xd7   :  { %853 = vmatpush3.msra.mxu1 %v620_v63  ;;  %888 = vmatpush3.msra.mxu0 %v652_v21 }
  0xd8   :  { %854 = vmatprep.subr.mxu1 %v635_v0  ;;  %889 = vmatprep.subr.mxu0 %v667_v23 }
  0xd9   :  { %855 = vmatpush3.msra.mxu1 %v619_v1  ;;  %890 = vmatpush3.msra.mxu0 %v651_v25 }
  0xda   :  { %856 = vmatprep.subr.mxu1 %v634_v18  ;;  %891 = vmatprep.subr.mxu0 %v666_v27 }
  0xdb   :  { %857 = vmatpush3.msra.mxu1 %v618_v20  ;;  %892 = vmatpush3.msra.mxu0 %v650_v30 }
  0xdc   :  { %858 = vmatprep.subr.mxu1 %v633_v22  ;;  %893 = vmatprep.subr.mxu0 %v665_v32 }
  0xdd   :  { %859 = vmatpush3.msra.mxu1 %v617_v24 }
  0xde   :  { %860 = vmatprep.subr.mxu1 %v632_v26 }
  0xdf   :  { %861 = vmatpush3.msra.mxu1 %v616_v29 }
  0xe0   :  { %862 = vmatprep.subr.mxu1 %v631_v31 }
  0xe1   :  { %863 = vmatpush3.msra.mxu1 %v615_v33 }
 0x18e   :  { %v220_v36 = vpop.f32.mrf.mxu1  ;;  %v291_v37 = vpop.f32.mrf.mxu0 }
 0x18f   :  { %v221_v44 = vadd.f32 %v220_v36, %v134_v40  ;;  %v292_v45 = vadd.f32 %v291_v37, %v142_v41  ;;  %v664_v36 = vld [vmem:[%s1371_s5 + $0x1b8] sm:$0xff]  ;;  %v614_v37 = vld [vmem:[%s1371_s5 + $0x28] sm:$0xff]  ;;  %v663_v40 = vld [vmem:[%s1371_s5 + $0x1b0] sm:$0xff] }
 0x190   :  { %v222_v38 = vpop.f32.mrf.mxu1  ;;  %v293_v39 = vpop.f32.mrf.mxu0  ;;  %v613_v41 = vld [vmem:[%s1371_s5 + $0x20] sm:$0xff] }
 0x191   :  { %v223_v42 = vadd.f32 %v222_v38, %v138_v34  ;;  %v294_v43 = vadd.f32 %v293_v39, %v146_v35  ;;  %v649_v34 = vld [vmem:[%s1371_s5 + $0x140] sm:$0xff]  ;;  %v630_v35 = vld [vmem:[%s1371_s5 + $0xa8] sm:$0xff]  ;;  %v648_v38 = vld [vmem:[%s1371_s5 + $0x138] sm:$0xff] }
 0x192   :  { %894 = vmatpush3.msra.mxu0 %v649_v34  ;;  %864 = vmatprep.subr.mxu1 %v630_v35  ;;  %v629_v39 = vld [vmem:[%s1371_s5 + $0xa0] sm:$0xff] }
 0x193   :  { %374 = vmax.xlane.f32.xlu0 %v223_v42  ;;  %528 = vmax.xlane.f32.xlu1 %v294_v43 }
 0x194   :  { %895 = vmatprep.subr.mxu0 %v664_v36  ;;  %865 = vmatpush3.msra.mxu1 %v614_v37 }
 0x195   :  { %896 = vmatpush3.msra.mxu0 %v648_v38  ;;  %866 = vmatprep.subr.mxu1 %v629_v39 }
 0x196   :  { %897 = vmatprep.subr.mxu0 %v663_v40  ;;  %867 = vmatpush3.msra.mxu1 %v613_v41 }
 0x197   :  { %296 = vmax.xlane.f32.xlu0 %v221_v44  ;;  %451 = vmax.xlane.f32.xlu1 %v292_v45 }
 0x21c   :  { %v375_v2 = vpop.xlane.xlu0 %374  ;;  %v529_v3 = vpop.xlane.xlu1 %528 }
 0x21d   :  { %v376_v4 = vsub.f32 %v223_v42, %v375_v2  ;;  %v530_v5 = vsub.f32 %v294_v43, %v529_v3  ;;  %v647_v42 = vld [vmem:[%s1371_s5 + $0x130] sm:$0xff]  ;;  %v628_v43 = vld [vmem:[%s1371_s5 + $0x98] sm:$0xff]  ;;  %v971_v2 = vmov 1966171168  }
 0x21e   :  { %898 = vmatpush3.msra.mxu0 %v647_v42  ;;  %868 = vmatprep.subr.mxu1 %v628_v43  ;;  %v310_v3 = vunpack.c.l.s4 %v971_v2 }
 0x21f   :  { %v377_v6 = vmul.f32 1.442695, %v376_v4  ;;  %v531_v7 = vmul.f32 1.442695, %v530_v5 }
 0x220   :  { %v297_v8 = vpop.xlane.xlu0 %296  ;;  %v452_v9 = vpop.xlane.xlu1 %451  ;;  %v311_v5 = vunpack.c.0.s8 %v310_v3 }
 0x221   :  { %931 = vpow2.f32 %v377_v6  ;;  %v298_v10 = vsub.f32 %v221_v44, %v297_v8  ;;  %v453_v11 = vsub.f32 %v292_v45, %v452_v9  ;;  %v662_v44 = vld [vmem:[%s1371_s5 + $0x1a8] sm:$0xff]  ;;  %v612_v45 = vld [vmem:[%s1371_s5 + $0x18] sm:$0xff]  ;;  %s972_s5 = smov [#allocation3]  }
 0x222   :  { %933 = vpow2.f32 %v531_v7  ;;  %899 = vmatprep.subr.mxu0 %v662_v44  ;;  %869 = vmatpush3.msra.mxu1 %v612_v45  ;;  %v1298_v7 = vsub.s32 %v311_v5, %v1084_v28  ;;  %s822_s10 = sshll.u32 %s972_s5, 4  ;;  %s823_s10 = int_to_ptr.vmem [resolvable:$true] %s822_s10 }
 0x223   :  { %v299_v12 = vmul.f32 1.442695, %v298_v10  ;;  %v454_v13 = vmul.f32 1.442695, %v453_v11  ;;  %900 = vmatpush3.msra.mxu0 %v646_v46  ;;  %870 = vmatprep.subr.mxu1 %v627_v47  ;;  %s947_s11 = scalar_lea.vmem %s823_s10, 512  ;;  %p952_p1 = scmp.lt.s32.totalorder %s823_s10, %s823_s10 }
 0x224   :  { %901 = vmatprep.subr.mxu0 %v661_v48  ;;  %871 = vmatpush3.msra.mxu1 %v611_v49  ;;  %p948_p0 = scmp.ne.s32.totalorder %s823_s10, %s947_s11  ;;  %p953_p2 = scmp.lt.s32.totalorder %s947_s11, %s947_s11 }
 0x225   :  { %935 = vpow2.f32 %v299_v12  ;;  %902 = vmatpush3.msra.mxu0 %v645_v50  ;;  %872 = vmatprep.subr.mxu1 %v626_v51 }
 0x226   :  { %937 = vpow2.f32 %v454_v13  ;;  %903 = vmatprep.subr.mxu0 %v660_v52  ;;  %873 = vmatpush3.msra.mxu1 %v610_v53  ;;  %p954_p3 = por %p953_p2, %p952_p1 }
 0x227   :  { %904 = vmatpush3.msra.mxu0 %v644_v54  ;;  %874 = vmatprep.subr.mxu1 %v625_v55 }
 0x228   :  { %905 = vmatprep.subr.mxu0 %v659_v56  ;;  %875 = vmatpush3.msra.mxu1 %v609_v57  ;;  %p955_p4 = pnand %p954_p3, %p948_p0 }
 0x229   :  { %906 = vmatpush3.msra.mxu0 %v643_v58 }
 0x22a   :  { %907 = vmatprep.subr.mxu0 %v658_v59 }
 0x22b   :  { %908 = vmatpush3.msra.mxu0 %v642_v60 }
 0x22c   :  { %909 = vmatprep.subr.mxu0 %v657_v61 }
 0x22d   :  { %910 = vmatpush3.msra.mxu0 %v641_v62 }
 0x22e   :  { %v1153_v14 = vpop.eup %931 }
 0x22f   :  { %379 = vadd.xlane.f32.xlu0 %v1153_v14  ;;  %v1156_v15 = vpop.eup %933 }
 0x232   :  { %v1158_v16 = vpop.eup %935 }
 0x233   :  { %533 = vadd.xlane.f32.xlu0 %v1156_v15  ;;  %301 = vadd.xlane.f32.xlu1 %v1158_v16  ;;  %v1162_v17 = vpop.eup %937 }
 0x237   :  { %456 = vadd.xlane.f32.xlu1 %v1162_v17 }
 0x2b8   :  { %v380_v63 = vpop.xlane.xlu0 %379 }
 0x2b9   :  { %939 = vrcp.f32 %v380_v63 }
 0x2bc   :  { %v534_v0 = vpop.xlane.xlu0 %533  ;;  %v302_v1 = vpop.xlane.xlu1 %301 }
 0x2bd   :  { %941 = vrcp.f32 %v534_v0 }
 0x2be   :  { %943 = vrcp.f32 %v302_v1 }
 0x2c0   :  { %v457_v4 = vpop.xlane.xlu1 %456 }
 0x2c1   :  { %945 = vrcp.f32 %v457_v4 }
 0x2c6   :  { %v940_v6 = vpop.eup %939 }
 0x2c7   :  { %v382_v8 = vmul.f32 %v940_v6, %v1153_v14 }
 0x2c9   :  { %v384_v9 = vadd.f32 1e-06, %v382_v8  ;;  %737 = vmatprep.mubr.f32.mxu1 %v382_v8 }
 0x2ca   :  { %v942_v10 = vpop.eup %941 }
 0x2cb   :  { %v944_v11 = vpop.eup %943  ;;  %v386_v12 = vcombine.high %v384_v9, %v384_v9  ;;  %v393_v13 = vrot.slane %v384_v9, %v1298_v7  ;;  %v536_v18 = vmul.f32 %v942_v10, %v1156_v15 }
 0x2cc   :  { %v304_v19 = vmul.f32 %v944_v11, %v1158_v16 }
 0x2cd   :  { %v400_v20 = vrot.slane %v386_v12, %v1298_v7  ;;  %v401_v21 = vcombine.high %v393_v13, %v393_v13  ;;  %v409_v28 = vrot.slane %v393_v13, %v1298_v7  ;;  %v538_v22 = vadd.f32 1e-06, %v536_v18  ;;  %807 = vmatprep.mubr.f32.mxu0 %v536_v18 }
 0x2ce   :  { %v946_v14 = vpop.eup %945  ;;  %v306_v23 = vadd.f32 1e-06, %v304_v19  ;;  %738 = vmatmul.mubr.f32.vlgmr.msra.gmra.mxu1 %v304_v19 }
 0x2cf   :  { %v402_v24 = vcombine.high %v400_v20, %v400_v20  ;;  %v416_v25 = vrot.slane %v400_v20, %v1298_v7  ;;  %v423_v26 = vrot.slane %v401_v21, %v1298_v7  ;;  %v431_v27 = vcombine.high %v409_v28, %v409_v28  ;;  %443 = vst.msk [vmem:[#allocation3 + $0x1] sm:$0x1] %vm365_vm2, %v409_v28 }
 0x2d0   :  { %v308_v15 = vcombine.high %v306_v23, %v306_v23  ;;  %v315_v16 = vrot.slane %v306_v23, %v1298_v7  ;;  %v540_v29 = vcombine.high %v538_v22, %v538_v22  ;;  %v547_v30 = vrot.slane %v538_v22, %v1298_v7 }
 0x2d1   :  { %v430_v31 = vrot.slane %v402_v24, %v1298_v7  ;;  %v432_v32 = vcombine.high %v416_v25, %v416_v25  ;;  %v433_v33 = vcombine.high %v423_v26, %v423_v26  ;;  %444 = vst.msk [vmem:[#allocation3 + $0x5] sm:$0x1] %vm365_vm2, %v423_v26  ;;  %445 = vst.msk [vmem:[#allocation3 + $0x9] sm:$0x1] %vm365_vm2, %v431_v27 }
 0x2d2   :  { %447 = vst.msk [vmem:[#allocation3 + $0x11] sm:$0x1] %vm365_vm2, %v416_v25  ;;  %v459_v34 = vmul.f32 %v946_v14, %v1162_v17  ;;  %v322_v35 = vrot.slane %v308_v15, %v1298_v7  ;;  %v323_v36 = vcombine.high %v315_v16, %v315_v16  ;;  %v331_v37 = vrot.slane %v315_v16, %v1298_v7 }
 0x2d3   :  { %v554_v38 = vrot.slane %v540_v29, %v1298_v7  ;;  %v434_v39 = vcombine.high %v430_v31, %v430_v31  ;;  %446 = vst.msk [vmem:[#allocation3 + $0xd] sm:$0x1] %vm365_vm2, %v433_v33  ;;  %448 = vst.msk [vmem:[#allocation3 + $0x15] sm:$0x1] %vm365_vm2, %v430_v31  ;;  %v555_v40 = vcombine.high %v547_v30, %v547_v30 }
 0x2d4   :  { %449 = vst.msk [vmem:[#allocation3 + $0x19] sm:$0x1] %vm365_vm2, %v432_v32  ;;  %v563_v41 = vrot.slane %v547_v30, %v1298_v7  ;;  %v461_v42 = vadd.f32 1e-06, %v459_v34  ;;  %808 = vmatmul.mubr.f32.vlgmr.msra.gmra.mxu0 %v459_v34  ;;  %v324_v17 = vcombine.high %v322_v35, %v322_v35  ;;  %v338_v43 = vrot.slane %v322_v35, %v1298_v7 }
 0x2d5   :  { %v345_v44 = vrot.slane %v323_v36, %v1298_v7  ;;  %v353_v45 = vcombine.high %v331_v37, %v331_v37  ;;  %366 = vst.msk [vmem:[#allocation3] sm:$0x1] %vm365_vm2, %v331_v37  ;;  %450 = vst.msk [vmem:[#allocation3 + $0x1d] sm:$0x1] %vm365_vm2, %v434_v39  ;;  %v556_v46 = vcombine.high %v554_v38, %v554_v38 }
 0x2d6   :  { %v570_v47 = vrot.slane %v554_v38, %v1298_v7  ;;  %v577_v48 = vrot.slane %v555_v40, %v1298_v7  ;;  %v585_v49 = vcombine.high %v563_v41, %v563_v41  ;;  %597 = vst.msk [vmem:[#allocation3 + $0x3] sm:$0x1] %vm365_vm2, %v563_v41  ;;  %v352_v50 = vrot.slane %v324_v17, %v1298_v7 }
 0x2d7   :  { %v354_v51 = vcombine.high %v338_v43, %v338_v43  ;;  %v355_v52 = vcombine.high %v345_v44, %v345_v44  ;;  %367 = vst.msk [vmem:[#allocation3 + $0x4] sm:$0x1] %vm365_vm2, %v345_v44  ;;  %368 = vst.msk [vmem:[#allocation3 + $0x8] sm:$0x1] %vm365_vm2, %v353_v45  ;;  %v463_v53 = vcombine.high %v461_v42, %v461_v42 }
 0x2d8   :  { %370 = vst.msk [vmem:[#allocation3 + $0x10] sm:$0x1] %vm365_vm2, %v338_v43  ;;  %v584_v54 = vrot.slane %v556_v46, %v1298_v7  ;;  %v586_v55 = vcombine.high %v570_v47, %v570_v47  ;;  %v587_v56 = vcombine.high %v577_v48, %v577_v48  ;;  %598 = vst.msk [vmem:[#allocation3 + $0x7] sm:$0x1] %vm365_vm2, %v577_v48 }
 0x2d9   :  { %599 = vst.msk [vmem:[#allocation3 + $0xb] sm:$0x1] %vm365_vm2, %v585_v49  ;;  %601 = vst.msk [vmem:[#allocation3 + $0x13] sm:$0x1] %vm365_vm2, %v570_v47  ;;  %v470_v57 = vrot.slane %v461_v42, %v1298_v7  ;;  %v356_v58 = vcombine.high %v352_v50, %v352_v50  ;;  %v477_v59 = vrot.slane %v463_v53, %v1298_v7 }
 0x2da   :  { %369 = vst.msk [vmem:[#allocation3 + $0xc] sm:$0x1] %vm365_vm2, %v355_v52  ;;  %371 = vst.msk [vmem:[#allocation3 + $0x14] sm:$0x1] %vm365_vm2, %v352_v50  ;;  %v588_v60 = vcombine.high %v584_v54, %v584_v54 }
 0x2db   :  { %372 = vst.msk [vmem:[#allocation3 + $0x18] sm:$0x1] %vm365_vm2, %v354_v51  ;;  %600 = vst.msk [vmem:[#allocation3 + $0xf] sm:$0x1] %vm365_vm2, %v587_v56  ;;  %v478_v61 = vcombine.high %v470_v57, %v470_v57  ;;  %v486_v62 = vrot.slane %v470_v57, %v1298_v7  ;;  %v479_v63 = vcombine.high %v477_v59, %v477_v59 }
 0x2dc   :  { %602 = vst.msk [vmem:[#allocation3 + $0x17] sm:$0x1] %vm365_vm2, %v584_v54  ;;  %603 = vst.msk [vmem:[#allocation3 + $0x1b] sm:$0x1] %vm365_vm2, %v586_v55  ;;  %v493_v0 = vrot.slane %v477_v59, %v1298_v7 }
 0x2dd   :  { %373 = vst.msk [vmem:[#allocation3 + $0x1c] sm:$0x1] %vm365_vm2, %v356_v58  ;;  %604 = vst.msk [vmem:[#allocation3 + $0x1f] sm:$0x1] %vm365_vm2, %v588_v60  ;;  %v500_v1 = vrot.slane %v478_v61, %v1298_v7  ;;  %v508_v2 = vcombine.high %v486_v62, %v486_v62  ;;  %v507_v3 = vrot.slane %v479_v63, %v1298_v7 }
 0x2de   :  { %520 = vst.msk [vmem:[#allocation3 + $0x2] sm:$0x1] %vm365_vm2, %v486_v62  ;;  %v509_v4 = vcombine.high %v493_v0, %v493_v0  ;;  %524 = vst.msk [vmem:[#allocation3 + $0x12] sm:$0x1] %vm365_vm2, %v493_v0 }
 0x2df   :  { %v510_v5 = vcombine.high %v500_v1, %v500_v1  ;;  %521 = vst.msk [vmem:[#allocation3 + $0x6] sm:$0x1] %vm365_vm2, %v500_v1  ;;  %522 = vst.msk [vmem:[#allocation3 + $0xa] sm:$0x1] %vm365_vm2, %v508_v2  ;;  %v511_v6 = vcombine.high %v507_v3, %v507_v3 }
 0x2e0   :  { %525 = vst.msk [vmem:[#allocation3 + $0x16] sm:$0x1] %vm365_vm2, %v507_v3  ;;  %526 = vst.msk [vmem:[#allocation3 + $0x1a] sm:$0x1] %vm365_vm2, %v509_v4 }
 0x2e1   :  { %523 = vst.msk [vmem:[#allocation3 + $0xe] sm:$0x1] %vm365_vm2, %v510_v5  ;;  %527 = vst.msk [vmem:[#allocation3 + $0x1e] sm:$0x1] %vm365_vm2, %v511_v6 }
 0x2e2   :  { %958 = shalt.err (!%p955_p4)
}
 0x2e3   :  { %s973_s12 = smov 64   ;;  %s974_s13 = smov 4   ;;  %vm813_vm3 = vcmask 31744  }
 0x2e4   :  { %828 = dma.vmem_to_hbm [thread:$0]  %s823_s10, 512, %s1373_s7, [#allocation4], %s973_s12, %s973_s12, %s974_s13  }
 0x38e   :  { %v876_v7 = vpop.f32.mrf.mxu1 }
 0x390   :  { %v877_v8 = vpop.f32.mrf.mxu1 }
 0x391   :  { %v878_v9 = vadd.f32 %v877_v8, %v876_v7 }
 0x393   :  { %v740_v12 = vadd.f32 1.9073486e-12, %v878_v9 }
 0x394   :  { %v911_v10 = vpop.f32.mrf.mxu0 }
 0x396   :  { %v912_v11 = vpop.f32.mrf.mxu0 }
 0x397   :  { %v913_v13 = vadd.f32 %v912_v11, %v911_v10 }
 0x399   :  { %v810_v18 = vadd.f32 %v913_v13, %v740_v12 }
 0x39b   :  { %814 = vst.msk [vmem:[%s1372_s6] sm:$0xff] %vm813_vm3, %v810_v18 }
 0x39c   :  { %967 = dma.done.wait [#allocation4], 512  }
 0x39d   :  { %968 = vsyncadd [#allocation4], 4294966784 }
 0x39e   :  { %834 = vsyncpa [#allocation4], 1 }

</bundles_post_ra>
